<compile_context>
chip_gen: v7x
topology: tpu7x:2x2x1
jax: 0.10.0
libtpu: 0.0.40
codegen_flags: <defaults>
</compile_context>

<pallas_src>
import functools
import math

import jax
import jax.numpy as jnp
from jax.experimental import pallas as pl
from jax.experimental.pallas import tpu as pltpu


def _round_up(x: int, m: int) -> int:
    return ((x + m - 1) // m) * m


def _cdiv(a: int, b: int) -> int:
    return (a + b - 1) // b


def _vmem_capacity_bytes() -> int:
    try:
        cap = int(pltpu.get_tpu_info().vmem_capacity_bytes)
        if cap > 0:
            return cap
    except Exception:
        pass
    return 64 * 1024 * 1024  # conservative default (v7x per-TensorCore)


def _sum_embed_kernel(tok_ids_ref, diac_ids_ref, tab_ref, out_ref, *,
                      tok_vocab, v_pad, k):
    # tok_ids_ref / diac_ids_ref : (TILE_R, k) int32 — k packed tokens per output row
    # tab_ref                    : (k*V_pad, k*E_tab) f32 block-diagonal fused table (resident)
    # out_ref                    : (TILE_R, k*E_tab) f32
    tile_r = out_ref.shape[0]
    kv = k * v_pad

    tok_ids = tok_ids_ref[...]                    # (TILE_R, k)
    diac_ids = diac_ids_ref[...] + tok_vocab      # offset into concatenated vocab

    iota = jax.lax.broadcasted_iota(jnp.int32, (tile_r, kv), 1)

    # Combined one-hot over the block-diagonal vocab axis: slot j occupies
    # columns [j*V_pad, (j+1)*V_pad); token/diac ranges inside a slot are
    # disjoint by construction, so a single OR suffices.
    oh = None
    for j in range(k):                            # static unroll, k = 128/E (small)
        base = j * v_pad
        oj = ((tok_ids[:, j:j + 1] + base) == iota) | \
             ((diac_ids[:, j:j + 1] + base) == iota)
        oh = oj if oh is None else (oh | oj)

    # One MXU pass produces the packed (tok_emb + diac_emb) rows directly.
    out_ref[...] = jnp.dot(oh.astype(jnp.float32), tab_ref[...],
                           preferred_element_type=jnp.float32)


def sum_embedding(token_inputs, diac_inputs, token_table, diac_table):
    """token_inputs, diac_inputs: (B, S) ints; tables: (V, E) f32 -> (B, S, E) f32."""
    B, S = token_inputs.shape
    Vt, E = token_table.shape
    Vd, E2 = diac_table.shape
    assert E == E2, "embedding sizes must match"
    N = B * S

    # ---- packing factor: k tokens per lane-dense output row ----------------
    if E % 128 == 0:
        k, E_tab = 1, E                              # already lane-dense
    else:
        slab = math.lcm(E, 128)
        if slab <= 512 and slab // E <= 32:
            k, E_tab = slab // E, E                  # pack k tokens, no E padding
        else:
            k, E_tab = 1, _round_up(E, 128)          # fallback: pad E, slice later
    E_blk = k * E_tab                                # output row width (multiple of 128)

    V = Vt + Vd
    V_pad = _round_up(V, 8)

    # ---- generation-aware tile sizing / VMEM budget -------------------------
    vmem_cap = _vmem_capacity_bytes()
    bytes_table = 2 * (k * V_pad) * E_blk * 4        # resident table, double-buffered
    per_row = (2 * E_blk * 4                         # output block, double-buffered
               + 2 * (k * V_pad) * 4                 # one-hot intermediate (mask + f32)
               + 2 * 2 * 128 * 4)                    # two id inputs, 2 bufs, lane-padded
    budget = int(vmem_cap * 0.6)
    tile_cap = (budget - bytes_table - (2 << 20)) // per_row
    tile_cap = max(64, min(2048, (tile_cap // 8) * 8))

    R = _cdiv(N, k)                                  # packed output rows needed
    n_steps = max(1, _cdiv(R, tile_cap))
    if n_steps == 1 and R >= 256:
        n_steps = 2                                  # let v7x's 2 TensorCores share the axis
    TILE_R = _round_up(_cdiv(R, n_steps), 8)
    R_pad = TILE_R * n_steps
    N_tok_pad = R_pad * k

    # ---- wrapper-side data prep ---------------------------------------------
    # Block-diagonal fused table: slot j occupies rows [j*V_pad,(j+1)*V_pad) and
    # columns [j*E_tab,(j+1)*E_tab), each holding concat([token_table; diac_table]).
    base_tab = jnp.zeros((V_pad, E_tab), jnp.float32)
    base_tab = base_tab.at[:Vt, :E].set(token_table.astype(jnp.float32))
    base_tab = base_tab.at[Vt:Vt + Vd, :E].set(diac_table.astype(jnp.float32))
    tab = jnp.zeros((k * V_pad, E_blk), jnp.float32)
    for j in range(k):
        tab = tab.at[j * V_pad:(j + 1) * V_pad, j * E_tab:(j + 1) * E_tab].set(base_tab)

    # Ids: flatten, pad with 0 (a valid row; padded outputs are sliced off), pack k per row.
    tok_ids = jnp.zeros((N_tok_pad,), jnp.int32).at[:N].set(
        token_inputs.reshape(N).astype(jnp.int32)).reshape(R_pad, k)
    diac_ids = jnp.zeros((N_tok_pad,), jnp.int32).at[:N].set(
        diac_inputs.reshape(N).astype(jnp.int32)).reshape(R_pad, k)

    vmem_need = bytes_table + TILE_R * per_row + (4 << 20)
    vmem_limit = min(int(vmem_cap * 0.9), vmem_need + (8 << 20))

    cost = pl.CostEstimate(
        flops=2 * R_pad * (k * V_pad) * E_blk,
        transcendentals=0,
        bytes_accessed=(2 * N_tok_pad * 4            # two id arrays
                        + (k * V_pad) * E_blk * 4    # fused table (read once)
                        + R_pad * E_blk * 4),        # packed output
    )

    kernel = functools.partial(_sum_embed_kernel, tok_vocab=Vt, v_pad=V_pad, k=k)

    out_pad = pl.pallas_call(
        kernel,
        out_shape=jax.ShapeDtypeStruct((R_pad, E_blk), jnp.float32),
        grid_spec=pltpu.PrefetchScalarGridSpec(
            num_scalar_prefetch=0,
            grid=(n_steps,),
            in_specs=[
                pl.BlockSpec((TILE_R, k), lambda i: (i, 0)),           # packed token ids
                pl.BlockSpec((TILE_R, k), lambda i: (i, 0)),           # packed diac ids
                pl.BlockSpec((k * V_pad, E_blk), lambda i: (0, 0)),    # resident fused table
            ],
            out_specs=pl.BlockSpec((TILE_R, E_blk), lambda i: (i, 0)),
        ),
        compiler_params=pltpu.CompilerParams(
            dimension_semantics=("parallel",),
            vmem_limit_bytes=vmem_limit,
        ),
        cost_estimate=cost,
    )(tok_ids, diac_ids, tab)

    # Unpack: contiguous reshape (free) + slice off row padding / column padding.
    return out_pad.reshape(R_pad * k, E_tab)[:N, :E].reshape(B, S, E)


if __name__ == "__main__":
    # Small, deterministic setup consistent with SumEmbedding(token_vocab, diac_vocab, E).
    B, S = 2, 8
    token_vocab_size = 48
    diac_vocab_size = 16
    embedding_size = 32

    key = jax.random.PRNGKey(0)
    k_tok_tab, k_diac_tab, k_tok_ids, k_diac_ids = jax.random.split(key, 4)

    # nn.Embedding default init: weights ~ N(0, 1)
    token_table = jax.random.normal(k_tok_tab, (token_vocab_size, embedding_size), jnp.float32)
    diac_table = jax.random.normal(k_diac_tab, (diac_vocab_size, embedding_size), jnp.float32)

    token_inputs = jax.random.randint(k_tok_ids, (B, S), 0, token_vocab_size, jnp.int32)
    diac_inputs = jax.random.randint(k_diac_ids, (B, S), 0, diac_vocab_size, jnp.int32)

    out = sum_embedding(token_inputs, diac_inputs, token_table, diac_table)
    out = jax.block_until_ready(out)

    # Pure-JAX reference check (exact gather + sum).
    ref = token_table[token_inputs] + diac_table[diac_inputs]
    assert out.shape == (B, S, embedding_size)
    assert jnp.allclose(out, ref, atol=1e-5), "mismatch vs reference"

    print("KERNEL_OK")
</pallas_src>

<mosaic_0001>
module attributes {stable_mosaic.version = 11 : i64} {
  func.func @_sum_embed_kernel(%arg0: i32, %arg1: memref<8x4xi32, #tpu.memory_space<vmem>>, %arg2: memref<8x4xi32, #tpu.memory_space<vmem>>, %arg3: memref<256x128xf32, #tpu.memory_space<vmem>>, %arg4: memref<8x128xf32, #tpu.memory_space<vmem>>) attributes {dimension_semantics = [#tpu.dimension_semantics<parallel>], iteration_bounds = array<i64: 1>, scalar_prefetch = 0 : i64, scratch_operands = 0 : i64, tpu.core_type = #tpu.core_type<tc>, window_params = [{transform_indices = @transform_0, window_bounds = array<i64: 8, 4>}, {transform_indices = @transform_1, window_bounds = array<i64: 8, 4>}, {pipeline_mode = #tpu.pipeline_mode<synchronous>, transform_indices = @transform_2, window_bounds = array<i64: 256, 128>}, {transform_indices = @transform_3, window_bounds = array<i64: 8, 128>}]} {
    %c0 = arith.constant 0 : index
    %c0_0 = arith.constant 0 : index
    %0 = vector.load %arg1[%c0, %c0_0] : memref<8x4xi32, #tpu.memory_space<vmem>>, vector<8x4xi32>
    %c0_1 = arith.constant 0 : index
    %c0_2 = arith.constant 0 : index
    %1 = vector.load %arg2[%c0_1, %c0_2] : memref<8x4xi32, #tpu.memory_space<vmem>>, vector<8x4xi32>
    %c48_i32 = arith.constant 48 : i32
    %2 = vector.broadcast %c48_i32 : i32 to vector<8x4xi32>
    %3 = arith.addi %1, %2 : vector<8x4xi32>
    %4 = tpu.iota {dimensions = array<i32: 1>} : vector<8x256xi32>
    %5 = vector.extract_strided_slice %0 {offsets = [0, 0], sizes = [8, 1], strides = [1, 1]} : vector<8x4xi32> to vector<8x1xi32>
    %c0_i32 = arith.constant 0 : i32
    %6 = vector.broadcast %c0_i32 : i32 to vector<8x1xi32>
    %7 = arith.addi %5, %6 : vector<8x1xi32>
    %8 = vector.broadcast %7 : vector<8x1xi32> to vector<8x256xi32>
    %9 = arith.cmpi eq, %8, %4 : vector<8x256xi32>
    %10 = vector.extract_strided_slice %3 {offsets = [0, 0], sizes = [8, 1], strides = [1, 1]} : vector<8x4xi32> to vector<8x1xi32>
    %c0_i32_3 = arith.constant 0 : i32
    %11 = vector.broadcast %c0_i32_3 : i32 to vector<8x1xi32>
    %12 = arith.addi %10, %11 : vector<8x1xi32>
    %13 = vector.broadcast %12 : vector<8x1xi32> to vector<8x256xi32>
    %14 = arith.cmpi eq, %13, %4 : vector<8x256xi32>
    %15 = arith.ori %9, %14 : vector<8x256xi1>
    %16 = vector.extract_strided_slice %0 {offsets = [0, 1], sizes = [8, 1], strides = [1, 1]} : vector<8x4xi32> to vector<8x1xi32>
    %c64_i32 = arith.constant 64 : i32
    %17 = vector.broadcast %c64_i32 : i32 to vector<8x1xi32>
    %18 = arith.addi %16, %17 : vector<8x1xi32>
    %19 = vector.broadcast %18 : vector<8x1xi32> to vector<8x256xi32>
    %20 = arith.cmpi eq, %19, %4 : vector<8x256xi32>
    %21 = vector.extract_strided_slice %3 {offsets = [0, 1], sizes = [8, 1], strides = [1, 1]} : vector<8x4xi32> to vector<8x1xi32>
    %c64_i32_4 = arith.constant 64 : i32
    %22 = vector.broadcast %c64_i32_4 : i32 to vector<8x1xi32>
    %23 = arith.addi %21, %22 : vector<8x1xi32>
    %24 = vector.broadcast %23 : vector<8x1xi32> to vector<8x256xi32>
    %25 = arith.cmpi eq, %24, %4 : vector<8x256xi32>
    %26 = arith.ori %20, %25 : vector<8x256xi1>
    %27 = arith.ori %15, %26 : vector<8x256xi1>
    %28 = vector.extract_strided_slice %0 {offsets = [0, 2], sizes = [8, 1], strides = [1, 1]} : vector<8x4xi32> to vector<8x1xi32>
    %c128_i32 = arith.constant 128 : i32
    %29 = vector.broadcast %c128_i32 : i32 to vector<8x1xi32>
    %30 = arith.addi %28, %29 : vector<8x1xi32>
    %31 = vector.broadcast %30 : vector<8x1xi32> to vector<8x256xi32>
    %32 = arith.cmpi eq, %31, %4 : vector<8x256xi32>
    %33 = vector.extract_strided_slice %3 {offsets = [0, 2], sizes = [8, 1], strides = [1, 1]} : vector<8x4xi32> to vector<8x1xi32>
    %c128_i32_5 = arith.constant 128 : i32
    %34 = vector.broadcast %c128_i32_5 : i32 to vector<8x1xi32>
    %35 = arith.addi %33, %34 : vector<8x1xi32>
    %36 = vector.broadcast %35 : vector<8x1xi32> to vector<8x256xi32>
    %37 = arith.cmpi eq, %36, %4 : vector<8x256xi32>
    %38 = arith.ori %32, %37 : vector<8x256xi1>
    %39 = arith.ori %27, %38 : vector<8x256xi1>
    %40 = vector.extract_strided_slice %0 {offsets = [0, 3], sizes = [8, 1], strides = [1, 1]} : vector<8x4xi32> to vector<8x1xi32>
    %c192_i32 = arith.constant 192 : i32
    %41 = vector.broadcast %c192_i32 : i32 to vector<8x1xi32>
    %42 = arith.addi %40, %41 : vector<8x1xi32>
    %43 = vector.broadcast %42 : vector<8x1xi32> to vector<8x256xi32>
    %44 = arith.cmpi eq, %43, %4 : vector<8x256xi32>
    %45 = vector.extract_strided_slice %3 {offsets = [0, 3], sizes = [8, 1], strides = [1, 1]} : vector<8x4xi32> to vector<8x1xi32>
    %c192_i32_6 = arith.constant 192 : i32
    %46 = vector.broadcast %c192_i32_6 : i32 to vector<8x1xi32>
    %47 = arith.addi %45, %46 : vector<8x1xi32>
    %48 = vector.broadcast %47 : vector<8x1xi32> to vector<8x256xi32>
    %49 = arith.cmpi eq, %48, %4 : vector<8x256xi32>
    %50 = arith.ori %44, %49 : vector<8x256xi1>
    %51 = arith.ori %39, %50 : vector<8x256xi1>
    %52 = arith.extui %51 : vector<8x256xi1> to vector<8x256xi32>
    %53 = arith.sitofp %52 : vector<8x256xi32> to vector<8x256xf32>
    %c0_7 = arith.constant 0 : index
    %c0_8 = arith.constant 0 : index
    %54 = vector.load %arg3[%c0_7, %c0_8] : memref<256x128xf32, #tpu.memory_space<vmem>>, vector<256x128xf32>
    %cst = arith.constant dense<0.000000e+00> : vector<8x128xf32>
    %55 = tpu.matmul %53, %54, %cst {dimension_numbers = #tpu.dot_dimension_numbers<[1], [0], [0], [1], [0, 0, 1, 1], [], []>} : vector<8x256xf32>, vector<256x128xf32>, vector<8x128xf32> -> vector<8x128xf32>
    %c0_9 = arith.constant 0 : index
    %c0_10 = arith.constant 0 : index
    %56 = vector.load %arg4[%c0_9, %c0_10] : memref<8x128xf32, #tpu.memory_space<vmem>>, vector<8x128xf32>
    tpu.vector_store %arg4[%c0_9, %c0_10], %55 {strides = array<i32>} : memref<8x128xf32, #tpu.memory_space<vmem>>, vector<8x128xf32>,
    return
  }
  func.func @transform_0(%arg0: i32) -> (i32, i32) {
    %c0_i32 = arith.constant 0 : i32
    %c0_i32_0 = arith.constant 0 : i32
    return %arg0, %c0_i32 : i32, i32
  }
  func.func @transform_1(%arg0: i32) -> (i32, i32) {
    %c0_i32 = arith.constant 0 : i32
    %c0_i32_0 = arith.constant 0 : i32
    return %arg0, %c0_i32 : i32, i32
  }
  func.func @transform_2(%arg0: i32) -> (i32, i32) {
    %c0_i32 = arith.constant 0 : i32
    %c0_i32_0 = arith.constant 0 : i32
    %c0_i32_1 = arith.constant 0 : i32
    return %c0_i32, %c0_i32_0 : i32, i32
  }
  func.func @transform_3(%arg0: i32) -> (i32, i32) {
    %c0_i32 = arith.constant 0 : i32
    %c0_i32_0 = arith.constant 0 : i32
    return %arg0, %c0_i32 : i32, i32
  }
}

</mosaic_0001>

<bundles_post_ra>
// kernel: tpu_custom_call.1
= control target key start
LH: loop header
LB: loop body
LE: loop exit
PB: predicated region body
PF: predicated region fallthrough
CT: control target
= control target key end

     0   :  { %8 = vsyncpa [#allocation3], 0  ;;  %s432_s0 = inlined_call_operand.vmem [shape: s32[8,4], index: 0, kind: input, shape index: {}]   ;;  %s433_s1 = inlined_call_operand.vmem [shape: s32[8,4], index: 1, kind: input, shape index: {}]   ;;  %s434_s2 = inlined_call_operand.hbm [shape: f32[256,128], index: 2, kind: input, shape index: {}]   ;;  %s435_s3 = inlined_call_operand.hbm [shape: f32[8,128], index: 3, kind: output, shape index: {}]  }
   0x1   :  { %9 = vsyncpa [#allocation4], 0  ;;  %s349_s12 = smov [#allocation2]   ;;  %s301_s16 = scalar_lea.hbm %s434_s2, 4096 }
   0x2   :  { %s19_s13 = sshll.u32 %s349_s12, 4  ;;  %p302_p0 = scmp.ne.s32.totalorder %s434_s2, %s301_s16  ;;  %s20_s13 = int_to_ptr.vmem [resolvable:$true] %s19_s13 }
   0x3   :  { %p305_p1 = scmp.lt.u32.totalorder %s301_s16, %s434_s2 }
   0x5   :  { %p307_p2 = pnand %p305_p1, %p302_p0 }
   0x7   :  { %310 = shalt.err (!%p307_p2)
}
   0x8   :  { %s311_s21 = scalar_lea.vmem %s20_s13, 4096  ;;  %p316_p4 = scmp.lt.s32.totalorder %s20_s13, %s20_s13 }
   0x9   :  { %p312_p3 = scmp.ne.s32.totalorder %s20_s13, %s311_s21  ;;  %p317_p5 = scmp.lt.s32.totalorder %s311_s21, %s311_s21 }
   0xb   :  { %p318_p6 = por %p317_p5, %p316_p4 }
   0xd   :  { %p319_p7 = pnand %p318_p6, %p312_p3 }
   0xf   :  { %322 = shalt.err (!%p319_p7)
}
  0x10   :  { %s350_s22 = smov 128   ;;  %s351_s23 = smov 8  }
  0x11   :  { %25 = dma.hbm_to_vmem [thread:$0]  %s434_s2, 4096, %s20_s13, [#allocation3], %s350_s22, %s350_s22, %s351_s23  }
  0x12   :  { %345 = dma.done.wait [#allocation3], 4096  }
  0x13   :  { %346 = vsyncadd [#allocation3], 4294963200  ;;  %v352_v0 = vmov 0   ;;  %v353_v1 = vmov 1   ;;  %v29_v2 = vld [vmem:[%s432_s0] sm:$0xff]  ;;  %v116_v7 = vld [vmem:[#allocation2 + $0x88] sm:$0xff]  ;;  %v32_v61 = vlaneseq }
  0x14   :  { %295 = vset.pattern.permute.xlu0 %v352_v0  ;;  %296 = vset.pattern.permute.xlu1 %v353_v1  ;;  %v30_v3 = vld [vmem:[%s433_s1] sm:$0xff]  ;;  %v47_v5 = vadd.s32 64, %v29_v2  ;;  %v100_v10 = vld [vmem:[#allocation2 + $0x8] sm:$0xff]  ;;  %v117_v11 = vld [vmem:[#allocation2 + $0x90] sm:$0xff]  ;;  %v63_v21 = vadd.s32 128, %v29_v2  ;;  %v354_v28 = vmov 2  }
  0x15   :  { %v115_v4 = vld [vmem:[#allocation2 + $0x80] sm:$0xff]  ;;  %36 = vperm.xlu0 %295, %v29_v2   ;;  %v31_v6 = vadd.s32 48, %v30_v3  ;;  %v118_v12 = vld [vmem:[#allocation2 + $0x98] sm:$0xff]  ;;  %v101_v15 = vld [vmem:[#allocation2 + $0x10] sm:$0xff]  ;;  %v79_v36 = vadd.s32 192, %v29_v2  ;;  %v355_v38 = vmov 3  }
  0x16   :  { %v99_v8 = vld [vmem:[#allocation2] sm:$0xff]  ;;  %v254_v9 = vpack.c.bf16 %v116_v7, %v115_v4  ;;  %49 = vperm.xlu1 %296, %v47_v5   ;;  %v102_v16 = vld [vmem:[#allocation2 + $0x18] sm:$0xff]  ;;  %v258_v18 = vpack.c.bf16 %v118_v12, %v117_v11  ;;  %v120_v19 = vld [vmem:[#allocation2 + $0xa8] sm:$0xff]  ;;  %v33_v63 = vand.u32 127, %v32_v61  ;;  %v356_v12 = vmov 0.0   ;;  %s357_s0 = smov [#allocation5]  }
  0x17   :  { %v53_v13 = vadd.s32 64, %v31_v6  ;;  %v256_v14 = vpack.c.bf16 %v100_v10, %v99_v8  ;;  %v119_v17 = vld [vmem:[#allocation2 + $0xa0] sm:$0xff]  ;;  %v260_v20 = vpack.c.bf16 %v102_v16, %v101_v15  ;;  %v104_v24 = vld [vmem:[#allocation2 + $0x28] sm:$0xff]  ;;  %v121_v25 = vld [vmem:[#allocation2 + $0xb0] sm:$0xff]  ;;  %v69_v27 = vadd.s32 128, %v31_v6  ;;  %s208_s1 = sshll.u32 %s357_s0, 4  ;;  %s209_s1 = int_to_ptr.vmem [resolvable:$true] %s208_s1 }
  0x18   :  { %255 = vmatprep.subr.bf16.mxu0 %v254_v9  ;;  %v262_v22 = vpack.c.bf16 %v120_v19, %v119_v17  ;;  %v103_v23 = vld [vmem:[#allocation2 + $0x20] sm:$0xff]  ;;  %v122_v26 = vld [vmem:[#allocation2 + $0xb8] sm:$0xff]  ;;  %v105_v31 = vld [vmem:[#allocation2 + $0x30] sm:$0xff]  ;;  %v85_v33 = vadd.s32 192, %v31_v6  ;;  %v34_v2 = vadd.s32 128, %v33_v63  ;;  %s323_s2 = scalar_lea.vmem %s209_s1, 128  ;;  %p328_p9 = scmp.lt.s32.totalorder %s209_s1, %s209_s1 }
  0x19   :  { %41 = vperm.xlu0 %295, %v31_v6   ;;  %257 = vmatpush3.bf16.msra.mxu0 %v256_v14  ;;  %v264_v29 = vpack.c.bf16 %v104_v24, %v103_v23  ;;  %v266_v30 = vpack.c.bf16 %v122_v26, %v121_v25  ;;  %v106_v32 = vld [vmem:[#allocation2 + $0x38] sm:$0xff]  ;;  %v123_v34 = vld [vmem:[#allocation2 + $0xc0] sm:$0xff]  ;;  %v124_v35 = vld [vmem:[#allocation2 + $0xc8] sm:$0xff]  ;;  %p324_p8 = scmp.ne.s32.totalorder %s209_s1, %s323_s2  ;;  %p329_p10 = scmp.lt.s32.totalorder %s323_s2, %s323_s2 }
  0x1a   :  { %259 = vmatprep.subr.bf16.mxu0 %v258_v18  ;;  %55 = vperm.xlu1 %296, %v53_v13   ;;  %v268_v37 = vpack.c.bf16 %v106_v32, %v105_v31  ;;  %v270_v39 = vpack.c.bf16 %v124_v35, %v123_v34  ;;  %v107_v40 = vld [vmem:[#allocation2 + $0x40] sm:$0xff]  ;;  %v108_v41 = vld [vmem:[#allocation2 + $0x48] sm:$0xff]  ;;  %v125_v42 = vld [vmem:[#allocation2 + $0xd0] sm:$0xff] }
  0x1b   :  { %v126_v43 = vld [vmem:[#allocation2 + $0xd8] sm:$0xff]  ;;  %v272_v44 = vpack.c.bf16 %v108_v41, %v107_v40  ;;  %v109_v46 = vld [vmem:[#allocation2 + $0x50] sm:$0xff]  ;;  %v127_v48 = vld [vmem:[#allocation2 + $0xe0] sm:$0xff]  ;;  %p330_p11 = por %p329_p10, %p328_p9 }
  0x1c   :  { %v274_v45 = vpack.c.bf16 %v126_v43, %v125_v42  ;;  %v110_v47 = vld [vmem:[#allocation2 + $0x58] sm:$0xff]  ;;  %v128_v49 = vld [vmem:[#allocation2 + $0xe8] sm:$0xff]  ;;  %v111_v52 = vld [vmem:[#allocation2 + $0x60] sm:$0xff] }
  0x1d   :  { %297 = vset.pattern.permute.xlu0 %v354_v28  ;;  %261 = vmatpush3.bf16.msra.mxu0 %v260_v20  ;;  %v276_v50 = vpack.c.bf16 %v110_v47, %v109_v46  ;;  %v278_v51 = vpack.c.bf16 %v128_v49, %v127_v48  ;;  %v112_v53 = vld [vmem:[#allocation2 + $0x68] sm:$0xff]  ;;  %v129_v54 = vld [vmem:[#allocation2 + $0xf0] sm:$0xff]  ;;  %v130_v55 = vld [vmem:[#allocation2 + $0xf8] sm:$0xff]  ;;  %p331_p12 = pnand %p330_p11, %p324_p8 }
  0x1e   :  { %65 = vperm.xlu0 %297, %v63_v21   ;;  %263 = vmatprep.subr.bf16.mxu0 %v262_v22  ;;  %v280_v56 = vpack.c.bf16 %v112_v53, %v111_v52  ;;  %v282_v57 = vpack.c.bf16 %v130_v55, %v129_v54  ;;  %v113_v58 = vld [vmem:[#allocation2 + $0x70] sm:$0xff]  ;;  %v114_v59 = vld [vmem:[#allocation2 + $0x78] sm:$0xff] }
  0x1f   :  { %298 = vset.pattern.permute.xlu1 %v354_v28  ;;  %v284_v60 = vpack.c.bf16 %v114_v59, %v113_v58 }
  0x20   :  { %71 = vperm.xlu1 %298, %v69_v27  }
  0x21   :  { %265 = vmatpush3.bf16.msra.mxu0 %v264_v29 }
  0x22   :  { %300 = vset.pattern.permute.xlu0 %v355_v38  ;;  %267 = vmatprep.subr.bf16.mxu0 %v266_v30 }
  0x23   :  { %87 = vperm.xlu0 %300, %v85_v33  }
  0x24   :  { %299 = vset.pattern.permute.xlu1 %v355_v38 }
  0x25   :  { %81 = vperm.xlu1 %299, %v79_v36   ;;  %269 = vmatpush3.bf16.msra.mxu0 %v268_v37 }
  0x26   :  { %271 = vmatprep.subr.bf16.mxu0 %v270_v39 }
  0x29   :  { %273 = vmatpush3.bf16.msra.mxu0 %v272_v44 }
  0x2a   :  { %275 = vmatprep.subr.bf16.mxu0 %v274_v45 }
  0x2d   :  { %277 = vmatpush3.bf16.msra.mxu0 %v276_v50 }
  0x2e   :  { %279 = vmatprep.subr.bf16.mxu0 %v278_v51 }
  0x31   :  { %281 = vmatpush3.bf16.msra.mxu0 %v280_v56 }
  0x32   :  { %283 = vmatprep.subr.bf16.mxu0 %v282_v57 }
  0x35   :  { %285 = vmatpush3.bf16.msra.mxu0 %v284_v60 }
  0x94   :  { %v37_v62 = vpop.permute.xlu0 %36 }
  0x95   :  { %v50_v0 = vpop.permute.xlu1 %49  ;;  %vm38_vm1 = vcmp.eq.s32.totalorder %v37_v62, %v33_v63  ;;  %vm39_vm7 = vcmp.eq.s32.totalorder %v37_v62, %v34_v2 }
  0x96   :  { %vm51_vm4 = vcmp.eq.s32.totalorder %v50_v0, %v33_v63  ;;  %vm52_vm9 = vcmp.eq.s32.totalorder %v50_v0, %v34_v2 }
  0x98   :  { %v42_v1 = vpop.permute.xlu0 %41 }
  0x99   :  { %vm43_vm0 = vcmp.eq.s32.totalorder %v42_v1, %v33_v63  ;;  %v56_v3 = vpop.permute.xlu1 %55  ;;  %vm44_vm2 = vcmp.eq.s32.totalorder %v42_v1, %v34_v2 }
  0x9a   :  { %vm57_vm3 = vcmp.eq.s32.totalorder %v56_v3, %v33_v63  ;;  %vm396_vm5 = vmor %vm38_vm1, %vm43_vm0  ;;  %vm58_vm6 = vcmp.eq.s32.totalorder %v56_v3, %v34_v2 }
  0x9b   :  { %vm400_vm8 = vmor %vm51_vm4, %vm57_vm3 }
  0x9c   :  { %vm404_vm10 = vmor %vm39_vm7, %vm44_vm2 }
  0x9d   :  { %v66_v6 = vpop.permute.xlu0 %65  ;;  %vm408_vm12 = vmor %vm52_vm9, %vm58_vm6 }
  0x9e   :  { %vm67_vm11 = vcmp.eq.s32.totalorder %v66_v6, %v33_v63  ;;  %vm61_vm13 = vmor %vm396_vm5, %vm400_vm8  ;;  %vm68_vm14 = vcmp.eq.s32.totalorder %v66_v6, %v34_v2 }
  0x9f   :  { %v72_v9 = vpop.permute.xlu1 %71  ;;  %vm62_vm2 = vmor %vm404_vm10, %vm408_vm12 }
  0xa0   :  { %vm73_vm15 = vcmp.eq.s32.totalorder %v72_v9, %v33_v63  ;;  %vm74_vm0 = vcmp.eq.s32.totalorder %v72_v9, %v34_v2 }
  0xa1   :  { %vm75_vm1 = vmor %vm67_vm11, %vm73_vm15 }
  0xa2   :  { %v88_v10 = vpop.permute.xlu0 %87  ;;  %vm76_vm4 = vmor %vm68_vm14, %vm74_vm0 }
  0xa3   :  { %vm89_vm3 = vcmp.eq.s32.totalorder %v88_v10, %v33_v63  ;;  %vm90_vm6 = vcmp.eq.s32.totalorder %v88_v10, %v34_v2  ;;  %vm77_vm7 = vmor %vm61_vm13, %vm75_vm1 }
  0xa4   :  { %v82_v11 = vpop.permute.xlu1 %81  ;;  %vm78_vm8 = vmor %vm62_vm2, %vm76_vm4 }
  0xa5   :  { %vm83_vm9 = vcmp.eq.s32.totalorder %v82_v11, %v33_v63  ;;  %vm84_vm5 = vcmp.eq.s32.totalorder %v82_v11, %v34_v2 }
  0xa6   :  { %vm91_vm11 = vmor %vm83_vm9, %vm89_vm3 }
  0xa7   :  { %vm92_vm15 = vmor %vm84_vm5, %vm90_vm6 }
  0xa8   :  { %vm93_vm10 = vmor %vm77_vm7, %vm91_vm11 }
  0xa9   :  { %vm94_vm12 = vmor %vm78_vm8, %vm92_vm15  ;;  %v217_v13 = vsel %vm93_vm10, 1.0, %v356_v12 }
  0xaa   :  { %v218_v14 = vsel %vm94_vm12, 1.0, %v356_v12 }
  0xab   :  { %195 = vmatprep.mubr.f32.mxu0 %v218_v14 }
  0xac   :  { %196 = vmatmul.mubr.f32.vlgmr.msra.gmra.mrb[0].mxu0 %v217_v13 }
 0x17f   :  { %v251_v15 = vpop.f32.mrb[0].mxu0 }
 0x180   :  { %v252_v16 = vpop.f32.mrb[1].mxu0 }
 0x181   :  { %v253_v17 = vadd.f32 %v252_v16, %v251_v15 }
 0x183   :  { %201 = vst [vmem:[#allocation5] sm:$0xff] %v253_v17 }
 0x184   :  { %334 = shalt.err (!%p331_p12)
}
 0x185   :  { %s335_s5 = scalar_lea.hbm %s435_s3, 128 }
 0x186   :  { %p336_p13 = scmp.ne.s32.totalorder %s435_s3, %s335_s5  ;;  %p339_p0 = scmp.lt.u32.totalorder %s335_s5, %s435_s3 }
 0x188   :  { %p341_p1 = pnand %p339_p0, %p336_p13 }
 0x18a   :  { %344 = shalt.err (!%p341_p1)
}
 0x18b   :  { %211 = dma.vmem_to_hbm [thread:$0]  %s209_s1, 128, %s435_s3, [#allocation4]  }
 0x18c   :  { %347 = dma.done.wait [#allocation4], 128  }
 0x18d   :  { %348 = vsyncadd [#allocation4], 4294967168 }
 0x18e   :  { %215 = vsyncpa [#allocation3], 1 }
 0x18f   :  { %216 = vsyncpa [#allocation4], 1 }

</bundles_post_ra>
